<compile_context>
chip_gen: v7x
topology: tpu7x:2x2x1
jax: 0.10.0
libtpu: 0.0.40
codegen_flags: <defaults>
</compile_context>

<pallas_src>
import functools

import jax
import jax.numpy as jnp
from jax.experimental import pallas as pl
from jax.experimental.pallas import tpu as pltpu


def _round_up(x: int, m: int) -> int:
    return (x + m - 1) // m * m


def _pick_tiles(n2: int, dp: int, budget_bytes: int = 24 * 1024 * 1024):
    """Pick (tq, tk) under a VMEM budget that is safe on v5e/v6e/v7x.

    The double-buffered query/key f32 blocks dominate: 2*(tq + tk)*dp*4 bytes.
    """
    m128 = _round_up(n2, 128)

    def fits(tq, tk):
        blocks = 8 * dp * (tq + tk)      # double-buffered q + k blocks (f32)
        scratch = 4 * tq * 128           # lane-dense denominator accumulator
        return blocks + scratch <= budget_bytes

    tk = 128
    for c in (512, 256):
        if c <= m128 and fits(128, c):
            tk = c
            break
    tq = 128
    for c in (1024, 512, 256):
        if c <= m128 and fits(c, tk):
            tq = c
            break
    # Keep >= 2 query blocks when possible so the "parallel" grid axis can be
    # split across both TensorCores (v7x megacore).
    while tq > 128 and _round_up(n2, tq) // tq < 2:
        tq //= 2
    return tq, tk


def _ntxent_kernel(zq_ref, zk_ref, pos_ref, out_ref, denom_sc, *,
                   inv_t: float, n_valid: int, tq: int, tk: int, nk: int):
    """Grid = (M//TQ, M//TK); q axis parallel, k axis is the reduction.

    zq_ref : (tq, dp) L2-normalized query rows, pre-scaled by 1/temperature.
    zk_ref : (tk, dp) L2-normalized key rows.
    pos_ref: (tq, 1)  cosine similarity of each row with its positive partner.
    denom_sc: (tq, 128) lane-dense running shifted-softmax denominator.
    """
    # program_id only at top level (interpret-mode / lowering safe).
    q = pl.program_id(0)
    k = pl.program_id(1)

    @pl.when(k == 0)
    def _init():
        denom_sc[...] = jnp.zeros_like(denom_sc)

    # One (tq, tk) MXU tile of (cosine similarity / temperature).
    sim_s = jax.lax.dot_general(
        zq_ref[...], zk_ref[...],
        dimension_numbers=(((1,), (1,)), ((), ())),
        preferred_element_type=jnp.float32)

    # Mask the diagonal term and the zero-padded key columns in-tile: no
    # constant-subtraction cancellation at small temperatures.
    row_ids = q * tq + jax.lax.broadcasted_iota(jnp.int32, (tq, tk), 0)
    col_ids = k * tk + jax.lax.broadcasted_iota(jnp.int32, (tq, tk), 1)
    drop = (row_ids == col_ids) | (col_ids >= n_valid)
    # Shifted softmax terms: exp((sim - 1)/T) <= 1, so no overflow at small T.
    e = jnp.where(drop, 0.0, jnp.exp(sim_s - inv_t))

    # Lane-dense accumulation: 128-wide lane-aligned VPU adds per step; the
    # single cross-lane (XLU) reduce is deferred to the finalize step.
    acc = denom_sc[...]
    for j in range(tk // 128):
        acc = acc + e[:, j * 128:(j + 1) * 128]
    denom_sc[...] = acc

    @pl.when(k == nk - 1)
    def _finalize():
        denom = jnp.sum(denom_sc[...], axis=-1, keepdims=True)        # (tq, 1)
        rows = q * tq + jax.lax.broadcasted_iota(jnp.int32, (tq, 1), 0)
        valid = rows < n_valid
        denom = jnp.where(valid, denom, 1.0)
        # -log(exp(pos/T) / denominator) = (1 - pos)/T + log(shifted denom)
        loss = (1.0 - pos_ref[...]) * inv_t + jnp.log(denom)
        out_ref[...] = jnp.where(valid, loss, 0.0)


def ntxent_loss(z_i: jax.Array, z_j: jax.Array, temperature: float = 1.0) -> jax.Array:
    """NT-Xent loss. z_i, z_j: (N, D) anchor / positive embeddings."""
    assert z_i.shape == z_j.shape and z_i.ndim == 2
    n, d = z_i.shape
    n2 = 2 * n
    inv_t = 1.0 / float(temperature)

    z = jnp.concatenate([z_i, z_j], axis=0).astype(jnp.float32)       # (2N, D)
    # Row-wise L2 normalization, hoisted out of the kernel (one fused pass).
    # rsqrt(max(|z|^2, eps^2)) == 1 / max(|z|, eps): F.cosine_similarity guard.
    zn = z * jax.lax.rsqrt(
        jnp.maximum(jnp.sum(z * z, axis=-1, keepdims=True), 1e-16))
    # Per-row positive-pair cosine similarity (also hoisted).
    zpn = jnp.concatenate([zn[n:], zn[:n]], axis=0)
    pos = jnp.sum(zn * zpn, axis=-1, keepdims=True)                    # (2N, 1)
    # Pre-scale the query operand by 1/T: inner loop computes exp(sim_s - 1/T).
    zq = zn * jnp.float32(inv_t)

    dp = _round_up(d, 128)
    tq, tk = _pick_tiles(n2, dp)
    m = _round_up(n2, max(tq, tk))     # pad rows UP to the tile, not down

    zq = jnp.pad(zq, ((0, m - n2), (0, dp - d)))
    zk = jnp.pad(zn, ((0, m - n2), (0, dp - d)))
    pos = jnp.pad(pos, ((0, m - n2), (0, 0)))

    nk = m // tk
    kernel = functools.partial(_ntxent_kernel, inv_t=inv_t, n_valid=n2,
                               tq=tq, tk=tk, nk=nk)

    cost = pl.CostEstimate(
        flops=2 * m * m * dp,
        transcendentals=m * m,
        bytes_accessed=(m // tq + 2) * m * dp * 4)

    losses = pl.pallas_call(
        kernel,
        out_shape=jax.ShapeDtypeStruct((m, 1), jnp.float32),
        grid_spec=pltpu.PrefetchScalarGridSpec(
            num_scalar_prefetch=0,
            grid=(m // tq, nk),
            in_specs=[
                pl.BlockSpec((tq, dp), lambda q, k: (q, 0)),   # scaled queries
                pl.BlockSpec((tk, dp), lambda q, k: (k, 0)),   # key stream
                pl.BlockSpec((tq, 1), lambda q, k: (q, 0)),    # positives
            ],
            out_specs=pl.BlockSpec((tq, 1), lambda q, k: (q, 0)),
            scratch_shapes=[pltpu.VMEM((tq, 128), jnp.float32)],
        ),
        compiler_params=pltpu.CompilerParams(
            dimension_semantics=("parallel", "arbitrary"),
            vmem_limit_bytes=48 * 1024 * 1024),
        cost_estimate=cost,
    )(zq, zk, pos)

    # Tiny epilogue reduction; padded rows contribute exactly 0.
    return jnp.sum(losses) / jnp.float32(n2)


def _ntxent_reference(z_i, z_j, temperature=1.0):
    # Pure-JAX reference mirroring the PyTorch module.
    n = z_i.shape[0]
    z = jnp.concatenate([z_i, z_j], axis=0)
    zn = z / jnp.maximum(jnp.linalg.norm(z, axis=-1, keepdims=True), 1e-8)
    sim = zn @ zn.T
    sim_ij = jnp.diagonal(sim, offset=n)
    sim_ji = jnp.diagonal(sim, offset=-n)
    positives = jnp.concatenate([sim_ij, sim_ji], axis=0)
    mask = 1.0 - jnp.eye(2 * n, dtype=jnp.float32)
    numerator = jnp.exp(positives / temperature)
    denominator = jnp.sum(mask * jnp.exp(sim / temperature), axis=1)
    return jnp.sum(-jnp.log(numerator / denominator)) / (2 * n)


if __name__ == "__main__":
    key = jax.random.PRNGKey(0)
    k1, k2 = jax.random.split(key)
    N, D = 8, 32  # small batch of embeddings
    z_i = jax.random.normal(k1, (N, D), dtype=jnp.float32)
    z_j = jax.random.normal(k2, (N, D), dtype=jnp.float32)

    loss = ntxent_loss(z_i, z_j, temperature=1.0)
    jax.block_until_ready(loss)
    ref = _ntxent_reference(z_i, z_j, temperature=1.0)
    assert jnp.allclose(loss, ref, rtol=1e-5, atol=1e-5), (loss, ref)

    loss2 = ntxent_loss(z_i, z_j, temperature=0.5)
    jax.block_until_ready(loss2)
    ref2 = _ntxent_reference(z_i, z_j, temperature=0.5)
    assert jnp.allclose(loss2, ref2, rtol=1e-5, atol=1e-5), (loss2, ref2)

    print("KERNEL_OK")
</pallas_src>

<mosaic_0001>
module attributes {stable_mosaic.version = 11 : i64} {
  func.func @_ntxent_kernel(%arg0: i32, %arg1: i32, %arg2: memref<128x128xf32, #tpu.memory_space<vmem>>, %arg3: memref<128x128xf32, #tpu.memory_space<vmem>>, %arg4: memref<128x1xf32, #tpu.memory_space<vmem>>, %arg5: memref<128x1xf32, #tpu.memory_space<vmem>>, %arg6: memref<128x128xf32, #tpu.memory_space<vmem>>) attributes {dimension_semantics = [#tpu.dimension_semantics<parallel>, #tpu.dimension_semantics<arbitrary>], iteration_bounds = array<i64: 1, 1>, scalar_prefetch = 0 : i64, scratch_operands = 1 : i64, tpu.core_type = #tpu.core_type<tc>, window_params = [{transform_indices = @transform_0, window_bounds = array<i64: 128, 128>}, {transform_indices = @transform_1, window_bounds = array<i64: 128, 128>}, {transform_indices = @transform_2, window_bounds = array<i64: 128, 1>}, {transform_indices = @transform_3, window_bounds = array<i64: 128, 1>}]} {
    %c0_i32 = arith.constant 0 : i32
    %0 = arith.cmpi eq, %arg1, %c0_i32 : i32
    %1 = arith.extui %0 : i1 to i32
    %c0_i32_0 = arith.constant 0 : i32
    %2 = arith.cmpi ne, %1, %c0_i32_0 : i32
    scf.if %2 {
      %cst_13 = arith.constant 0.000000e+00 : f32
      %29 = vector.broadcast %cst_13 : f32 to vector<128x128xf32>
      %c0_14 = arith.constant 0 : index
      %c0_15 = arith.constant 0 : index
      %30 = vector.load %arg6[%c0_14, %c0_15] : memref<128x128xf32, #tpu.memory_space<vmem>>, vector<128x128xf32>
      tpu.vector_store %arg6[%c0_14, %c0_15], %29 {strides = array<i32>} : memref<128x128xf32, #tpu.memory_space<vmem>>, vector<128x128xf32>,
    } else {
    }
    %c0 = arith.constant 0 : index
    %c0_1 = arith.constant 0 : index
    %3 = vector.load %arg2[%c0, %c0_1] : memref<128x128xf32, #tpu.memory_space<vmem>>, vector<128x128xf32>
    %c0_2 = arith.constant 0 : index
    %c0_3 = arith.constant 0 : index
    %4 = vector.load %arg3[%c0_2, %c0_3] : memref<128x128xf32, #tpu.memory_space<vmem>>, vector<128x128xf32>
    %cst = arith.constant dense<0.000000e+00> : vector<128x128xf32>
    %5 = tpu.matmul %3, %4, %cst {dimension_numbers = #tpu.dot_dimension_numbers<[1], [1], [0], [0], [0, 0, 1, 0], [], []>} : vector<128x128xf32>, vector<128x128xf32>, vector<128x128xf32> -> vector<128x128xf32>
    %c128_i32 = arith.constant 128 : i32
    %6 = arith.muli %arg0, %c128_i32 : i32
    %7 = tpu.iota {dimensions = array<i32: 0>} : vector<128x128xi32>
    %8 = vector.broadcast %6 : i32 to vector<128x128xi32>
    %9 = arith.addi %8, %7 : vector<128x128xi32>
    %c128_i32_4 = arith.constant 128 : i32
    %10 = arith.muli %arg1, %c128_i32_4 : i32
    %11 = tpu.iota {dimensions = array<i32: 1>} : vector<128x128xi32>
    %12 = vector.broadcast %10 : i32 to vector<128x128xi32>
    %13 = arith.addi %12, %11 : vector<128x128xi32>
    %14 = arith.cmpi eq, %9, %13 : vector<128x128xi32>
    %c16_i32 = arith.constant 16 : i32
    %15 = vector.broadcast %c16_i32 : i32 to vector<128x128xi32>
    %16 = arith.cmpi sge, %13, %15 : vector<128x128xi32>
    %17 = arith.ori %14, %16 : vector<128x128xi1>
    %cst_5 = arith.constant 1.000000e+00 : f32
    %18 = vector.broadcast %cst_5 : f32 to vector<128x128xf32>
    %19 = arith.subf %5, %18 : vector<128x128xf32>
    %20 = math.exp %19 : vector<128x128xf32>
    %cst_6 = arith.constant 0.000000e+00 : f32
    %21 = vector.broadcast %cst_6 : f32 to vector<128x128xf32>
    %22 = arith.select %17, %21, %20 : vector<128x128xi1>, vector<128x128xf32>
    %c0_7 = arith.constant 0 : index
    %c0_8 = arith.constant 0 : index
    %23 = vector.load %arg6[%c0_7, %c0_8] : memref<128x128xf32, #tpu.memory_space<vmem>>, vector<128x128xf32>
    %24 = arith.addf %23, %22 : vector<128x128xf32>
    %c0_9 = arith.constant 0 : index
    %c0_10 = arith.constant 0 : index
    %25 = vector.load %arg6[%c0_9, %c0_10] : memref<128x128xf32, #tpu.memory_space<vmem>>, vector<128x128xf32>
    tpu.vector_store %arg6[%c0_9, %c0_10], %24 {strides = array<i32>} : memref<128x128xf32, #tpu.memory_space<vmem>>, vector<128x128xf32>,
    %c0_i32_11 = arith.constant 0 : i32
    %26 = arith.cmpi eq, %arg1, %c0_i32_11 : i32
    %27 = arith.extui %26 : i1 to i32
    %c0_i32_12 = arith.constant 0 : i32
    %28 = arith.cmpi ne, %27, %c0_i32_12 : i32
    scf.if %28 {
      %c0_13 = arith.constant 0 : index
      %c0_14 = arith.constant 0 : index
      %29 = vector.load %arg6[%c0_13, %c0_14] : memref<128x128xf32, #tpu.memory_space<vmem>>, vector<128x128xf32>
      %cst_15 = arith.constant dense<0.000000e+00> : vector<128xf32>
      %30 = vector.multi_reduction <add>, %29, %cst_15 [1] : vector<128x128xf32> to vector<128xf32>
      %31 = vector.shape_cast %30 : vector<128xf32> to vector<128x1xf32>
      %c128_i32_16 = arith.constant 128 : i32
      %32 = arith.muli %arg0, %c128_i32_16 : i32
      %33 = tpu.iota {dimensions = array<i32: 0>} : vector<128x1xi32>
      %34 = vector.broadcast %32 : i32 to vector<128x1xi32>
      %35 = arith.addi %34, %33 : vector<128x1xi32>
      %c16_i32_17 = arith.constant 16 : i32
      %36 = vector.broadcast %c16_i32_17 : i32 to vector<128x1xi32>
      %37 = arith.cmpi slt, %35, %36 : vector<128x1xi32>
      %cst_18 = arith.constant 1.000000e+00 : f32
      %38 = vector.broadcast %cst_18 : f32 to vector<128x1xf32>
      %39 = arith.select %37, %31, %38 : vector<128x1xi1>, vector<128x1xf32>
      %c0_19 = arith.constant 0 : index
      %c0_20 = arith.constant 0 : index
      %40 = vector.load %arg4[%c0_19, %c0_20] : memref<128x1xf32, #tpu.memory_space<vmem>>, vector<128x1xf32>
      %cst_21 = arith.constant 1.000000e+00 : f32
      %41 = vector.broadcast %cst_21 : f32 to vector<128x1xf32>
      %42 = arith.subf %41, %40 : vector<128x1xf32>
      %cst_22 = arith.constant 1.000000e+00 : f32
      %43 = vector.broadcast %cst_22 : f32 to vector<128x1xf32>
      %44 = arith.mulf %42, %43 : vector<128x1xf32>
      %45 = math.log %39 : vector<128x1xf32>
      %46 = arith.addf %44, %45 : vector<128x1xf32>
      %cst_23 = arith.constant 0.000000e+00 : f32
      %47 = vector.broadcast %cst_23 : f32 to vector<128x1xf32>
      %48 = arith.select %37, %46, %47 : vector<128x1xi1>, vector<128x1xf32>
      %c0_24 = arith.constant 0 : index
      %c0_25 = arith.constant 0 : index
      %49 = vector.load %arg5[%c0_24, %c0_25] : memref<128x1xf32, #tpu.memory_space<vmem>>, vector<128x1xf32>
      tpu.vector_store %arg5[%c0_24, %c0_25], %48 {strides = array<i32>} : memref<128x1xf32, #tpu.memory_space<vmem>>, vector<128x1xf32>,
    } else {
    }
    return
  }
  func.func @transform_0(%arg0: i32, %arg1: i32) -> (i32, i32) {
    %c0_i32 = arith.constant 0 : i32
    %c0_i32_0 = arith.constant 0 : i32
    return %arg0, %c0_i32 : i32, i32
  }
  func.func @transform_1(%arg0: i32, %arg1: i32) -> (i32, i32) {
    %c0_i32 = arith.constant 0 : i32
    %c0_i32_0 = arith.constant 0 : i32
    return %arg1, %c0_i32 : i32, i32
  }
  func.func @transform_2(%arg0: i32, %arg1: i32) -> (i32, i32) {
    %c0_i32 = arith.constant 0 : i32
    %c0_i32_0 = arith.constant 0 : i32
    return %arg0, %c0_i32 : i32, i32
  }
  func.func @transform_3(%arg0: i32, %arg1: i32) -> (i32, i32) {
    %c0_i32 = arith.constant 0 : i32
    %c0_i32_0 = arith.constant 0 : i32
    return %arg0, %c0_i32 : i32, i32
  }
}

</mosaic_0001>

<bundles_post_ra>
// kernel: tpu_custom_call.1
= control target key start
LH: loop header
LB: loop body
LE: loop exit
PB: predicated region body
PF: predicated region fallthrough
CT: control target
= control target key end

     0   :  { %8 = vsyncpa [#allocation4], 0  ;;  %s799_s12 = smov [#allocation3]   ;;  %s953_s0 = inlined_call_operand.vmem [shape: f32[128,128], index: 0, kind: input, shape index: {}]   ;;  %s954_s1 = inlined_call_operand.hbm [shape: f32[128,128], index: 1, kind: input, shape index: {}]   ;;  %s955_s2 = inlined_call_operand.vmem [shape: f32[128,1], index: 2, kind: input, shape index: {}]   ;;  %s956_s3 = inlined_call_operand.vmem [shape: f32[128,1], index: 3, kind: output, shape index: {}]  }
   0x1   :  { %s16_s13 = sshll.u32 %s799_s12, 4  ;;  %s775_s16 = scalar_lea.hbm %s954_s1, 2048  ;;  %s17_s13 = int_to_ptr.vmem [resolvable:$true] %s16_s13 }
   0x2   :  { %p776_p0 = scmp.ne.s32.totalorder %s954_s1, %s775_s16  ;;  %p779_p1 = scmp.lt.u32.totalorder %s775_s16, %s954_s1 }
   0x4   :  { %p781_p2 = pnand %p779_p1, %p776_p0 }
   0x6   :  { %784 = shalt.err (!%p781_p2)
}
   0x7   :  { %s785_s21 = scalar_lea.vmem %s17_s13, 2048  ;;  %p790_p4 = scmp.lt.s32.totalorder %s17_s13, %s17_s13 }
   0x8   :  { %p786_p3 = scmp.ne.s32.totalorder %s17_s13, %s785_s21  ;;  %p791_p5 = scmp.lt.s32.totalorder %s785_s21, %s785_s21 }
   0xa   :  { %p792_p6 = por %p791_p5, %p790_p4 }
   0xc   :  { %p793_p7 = pnand %p792_p6, %p786_p3 }
   0xe   :  { %796 = shalt.err (!%p793_p7)
}
   0xf   :  { %s800_s22 = smov 128   ;;  %s801_s23 = smov 8  }
  0x10   :  { %22 = dma.hbm_to_vmem [thread:$0]  %s954_s1, 2048, %s17_s13, [#allocation4], %s800_s22, %s800_s22, %s801_s23  }
  0x11   :  { %797 = dma.done.wait [#allocation4], 2048  }
  0x12   :  { %798 = vsyncadd [#allocation4], 4294965248  ;;  %v64_v0 = vld [vmem:[#allocation3] sm:$0xff]  ;;  %v65_v1 = vld [vmem:[#allocation3 + $0x8] sm:$0xff]  ;;  %vm589_vm0 = vcmask 7168   ;;  %v802_v40 = vmov 0.0   ;;  %v226_v47 = vlaneseq }
  0x13   :  { %v66_v2 = vld [vmem:[#allocation3 + $0x10] sm:$0xff]  ;;  %v715_v3 = vpack.c.bf16 %v65_v1, %v64_v0  ;;  %v67_v4 = vld [vmem:[#allocation3 + $0x18] sm:$0xff]  ;;  %v48_v6 = vld [vmem:[%s953_s0] sm:$0xff]  ;;  %592 = vst.msk [vmem:[%s956_s3 + $0x10] sm:$0xff] %vm589_vm0, %v802_v40 }
  0x14   :  { %v719_v5 = vpack.c.bf16 %v67_v4, %v66_v2  ;;  %v68_v7 = vld [vmem:[#allocation3 + $0x20] sm:$0xff]  ;;  %v69_v8 = vld [vmem:[#allocation3 + $0x28] sm:$0xff]  ;;  %691 = vmatprep.mubr.f32.mxu0 %v48_v6  ;;  %v70_v11 = vld [vmem:[#allocation3 + $0x30] sm:$0xff]  ;;  %593 = vst.msk [vmem:[%s956_s3 + $0x18] sm:$0xff] %vm589_vm0, %v802_v40  ;;  %v227_v54 = vshrl.u32 %v226_v47, 7  ;;  %v262_v55 = vand.u32 127, %v226_v47 }
  0x15   :  { %716 = vmatprep.subr.bf16.mxu0 %v715_v3  ;;  %747 = vmatprep.subr.bf16.mxu1 %v715_v3  ;;  %v56_v9 = vld [vmem:[%s953_s0 + $0x40] sm:$0xff]  ;;  %v723_v10 = vpack.c.bf16 %v69_v8, %v68_v7  ;;  %v71_v12 = vld [vmem:[#allocation3 + $0x38] sm:$0xff]  ;;  %v73_v15 = vld [vmem:[#allocation3 + $0x48] sm:$0xff]  ;;  %594 = vst.msk [vmem:[%s956_s3 + $0x20] sm:$0xff] %vm589_vm0, %v802_v40 }
  0x16   :  { %718 = vmatpush3.bf16.xpose.msra.mxu0 %v715_v3  ;;  %755 = vmatpush3.bf16.xpose.msra.mxu1 %v715_v3  ;;  %v727_v13 = vpack.c.bf16 %v71_v12, %v70_v11  ;;  %v72_v14 = vld [vmem:[#allocation3 + $0x40] sm:$0xff]  ;;  %v74_v17 = vld [vmem:[#allocation3 + $0x50] sm:$0xff]  ;;  %v75_v18 = vld [vmem:[#allocation3 + $0x58] sm:$0xff]  ;;  %595 = vst.msk [vmem:[%s956_s3 + $0x28] sm:$0xff] %vm589_vm0, %v802_v40  ;;  %vm265_vm1 = vcmp.eq.s32.totalorder %v227_v54, %v262_v55  ;;  %vm281_vm2 = vcmp.ge.s32.totalorder %v262_v55, 16  ;;  %v228_v60 = vadd.s32 8, %v227_v54 }
  0x17   :  { %720 = vmatprep.subr.bf16.mxu0 %v719_v5  ;;  %748 = vmatprep.subr.bf16.mxu1 %v719_v5  ;;  %v731_v16 = vpack.c.bf16 %v73_v15, %v72_v14  ;;  %v735_v19 = vpack.c.bf16 %v75_v18, %v74_v17  ;;  %v76_v20 = vld [vmem:[#allocation3 + $0x60] sm:$0xff]  ;;  %v77_v21 = vld [vmem:[#allocation3 + $0x68] sm:$0xff]  ;;  %v78_v23 = vld [vmem:[#allocation3 + $0x70] sm:$0xff]  ;;  %596 = vst.msk [vmem:[%s956_s3 + $0x30] sm:$0xff] %vm589_vm0, %v802_v40 }
  0x18   :  { %703 = vmatprep.mubr.f32.mxu1 %v56_v9  ;;  %v739_v22 = vpack.c.bf16 %v77_v21, %v76_v20  ;;  %v79_v24 = vld [vmem:[#allocation3 + $0x78] sm:$0xff]  ;;  %v49_v26 = vld [vmem:[%s953_s0 + $0x8] sm:$0xff]  ;;  %v50_v28 = vld [vmem:[%s953_s0 + $0x10] sm:$0xff]  ;;  %597 = vst.msk [vmem:[%s956_s3 + $0x38] sm:$0xff] %vm589_vm0, %v802_v40  ;;  %vm266_vm4 = vcmp.eq.s32.totalorder %v228_v60, %v262_v55 }
  0x19   :  { %v743_v25 = vpack.c.bf16 %v79_v24, %v78_v23  ;;  %v57_v27 = vld [vmem:[%s953_s0 + $0x48] sm:$0xff]  ;;  %v58_v29 = vld [vmem:[%s953_s0 + $0x50] sm:$0xff]  ;;  %v51_v30 = vld [vmem:[%s953_s0 + $0x18] sm:$0xff]  ;;  %598 = vst.msk [vmem:[%s956_s3 + $0x40] sm:$0xff] %vm589_vm0, %v802_v40 }
  0x1a   :  { %v59_v31 = vld [vmem:[%s953_s0 + $0x58] sm:$0xff]  ;;  %v52_v32 = vld [vmem:[%s953_s0 + $0x20] sm:$0xff]  ;;  %v53_v34 = vld [vmem:[%s953_s0 + $0x28] sm:$0xff]  ;;  %599 = vst.msk [vmem:[%s956_s3 + $0x48] sm:$0xff] %vm589_vm0, %v802_v40 }
  0x1b   :  { %v60_v33 = vld [vmem:[%s953_s0 + $0x60] sm:$0xff]  ;;  %v61_v35 = vld [vmem:[%s953_s0 + $0x68] sm:$0xff]  ;;  %v54_v36 = vld [vmem:[%s953_s0 + $0x30] sm:$0xff]  ;;  %600 = vst.msk [vmem:[%s956_s3 + $0x50] sm:$0xff] %vm589_vm0, %v802_v40 }
  0x1c   :  { %v62_v37 = vld [vmem:[%s953_s0 + $0x70] sm:$0xff]  ;;  %v55_v38 = vld [vmem:[%s953_s0 + $0x38] sm:$0xff]  ;;  %601 = vst.msk [vmem:[%s956_s3 + $0x58] sm:$0xff] %vm589_vm0, %v802_v40  ;;  %602 = vst.msk [vmem:[%s956_s3 + $0x60] sm:$0xff] %vm589_vm0, %v802_v40 }
  0x1d   :  { %v63_v39 = vld [vmem:[%s953_s0 + $0x78] sm:$0xff]  ;;  %603 = vst.msk [vmem:[%s956_s3 + $0x68] sm:$0xff] %vm589_vm0, %v802_v40  ;;  %604 = vst.msk [vmem:[%s956_s3 + $0x70] sm:$0xff] %vm589_vm0, %v802_v40  ;;  %v493_v7 = vld [vmem:[%s955_s2] sm:$0xff] }
  0x1e   :  { %722 = vmatpush3.bf16.xpose.msra.mxu0 %v719_v5  ;;  %756 = vmatpush3.bf16.xpose.msra.mxu1 %v719_v5  ;;  %605 = vst.msk [vmem:[%s956_s3 + $0x78] sm:$0xff] %vm589_vm0, %v802_v40  ;;  %vm282_vm3 = vmor %vm265_vm1, %vm281_vm2  ;;  %v509_v8 = vsub.f32 1.0, %v493_v7 }
  0x1f   :  { %724 = vmatprep.subr.bf16.mxu0 %v723_v10  ;;  %749 = vmatprep.subr.bf16.mxu1 %v723_v10  ;;  %vm283_vm5 = vmor %vm266_vm4, %vm281_vm2 }
  0x26   :  { %726 = vmatpush3.bf16.xpose.msra.mxu0 %v723_v10  ;;  %757 = vmatpush3.bf16.xpose.msra.mxu1 %v723_v10  ;;  %v494_v10 = vld [vmem:[%s955_s2 + $0x8] sm:$0xff] }
  0x27   :  { %728 = vmatprep.subr.bf16.mxu0 %v727_v13  ;;  %750 = vmatprep.subr.bf16.mxu1 %v727_v13 }
  0x2e   :  { %730 = vmatpush3.bf16.xpose.msra.mxu0 %v727_v13  ;;  %758 = vmatpush3.bf16.xpose.msra.mxu1 %v727_v13  ;;  %v510_v13 = vsub.f32 1.0, %v494_v10 }
  0x2f   :  { %732 = vmatprep.subr.bf16.mxu0 %v731_v16  ;;  %751 = vmatprep.subr.bf16.mxu1 %v731_v16 }
  0x36   :  { %734 = vmatpush3.bf16.xpose.msra.mxu0 %v731_v16  ;;  %759 = vmatpush3.bf16.xpose.msra.mxu1 %v731_v16 }
  0x37   :  { %736 = vmatprep.subr.bf16.mxu0 %v735_v19  ;;  %752 = vmatprep.subr.bf16.mxu1 %v735_v19 }
  0x3e   :  { %738 = vmatpush3.bf16.xpose.msra.mxu0 %v735_v19  ;;  %760 = vmatpush3.bf16.xpose.msra.mxu1 %v735_v19 }
  0x3f   :  { %740 = vmatprep.subr.bf16.mxu0 %v739_v22  ;;  %753 = vmatprep.subr.bf16.mxu1 %v739_v22 }
  0x46   :  { %742 = vmatpush3.bf16.xpose.msra.mxu0 %v739_v22  ;;  %761 = vmatpush3.bf16.xpose.msra.mxu1 %v739_v22 }
  0x47   :  { %744 = vmatprep.subr.bf16.mxu0 %v743_v25  ;;  %754 = vmatprep.subr.bf16.mxu1 %v743_v25 }
  0x4e   :  { %746 = vmatpush3.bf16.xpose.msra.mxu0 %v743_v25  ;;  %762 = vmatpush3.bf16.xpose.msra.mxu1 %v743_v25 }
  0x55   :  { %692 = vmatmul.mubr.f32.vlgmr.msra.gmra.mrb[0].mxu0 %v49_v26  ;;  %704 = vmatmul.mubr.f32.vlgmr.msra.gmra.mrb[0].mxu1 %v57_v27 }
  0x56   :  { %694 = vmatprep.mubr.f32.mxu0 %v50_v28  ;;  %706 = vmatprep.mubr.f32.mxu1 %v58_v29 }
  0x59   :  { %695 = vmatmul.mubr.f32.gmra.mrb[2].mxu0 %v51_v30  ;;  %707 = vmatmul.mubr.f32.gmra.mrb[2].mxu1 %v59_v31 }
  0x5a   :  { %697 = vmatprep.mubr.f32.mxu0 %v52_v32  ;;  %709 = vmatprep.mubr.f32.mxu1 %v60_v33 }
  0x5d   :  { %698 = vmatmul.mubr.f32.gmra.mrb[4].mxu0 %v53_v34  ;;  %710 = vmatmul.mubr.f32.gmra.mrb[4].mxu1 %v61_v35 }
  0x5e   :  { %700 = vmatprep.mubr.f32.mxu0 %v54_v36  ;;  %712 = vmatprep.mubr.f32.mxu1 %v62_v37 }
  0x61   :  { %701 = vmatmul.mubr.f32.gmra.mrb[6].mxu0 %v55_v38  ;;  %713 = vmatmul.mubr.f32.gmra.mrb[6].mxu1 %v63_v39 }
 0x128   :  { %v693_v41 = vpop.f32.mrb[0].mxu0  ;;  %v705_v42 = vpop.f32.mrb[0].mxu1 }
 0x129   :  { %v612_v43 = vadd.f32 -1.0, %v693_v41  ;;  %v146_v44 = vpop.f32.mrb[1].mxu0  ;;  %v186_v45 = vpop.f32.mrb[1].mxu1 }
 0x12a   :  { %v611_v46 = vadd.f32 -1.0, %v146_v44 }
 0x12b   :  { %v316_v48 = vmul.f32 1.442695, %v612_v43 }
 0x12c   :  { %v314_v49 = vmul.f32 1.442695, %v611_v46  ;;  %v696_v50 = vpop.f32.mrb[2].mxu0  ;;  %v708_v51 = vpop.f32.mrb[2].mxu1 }
 0x12d   :  { %v156_v52 = vpop.f32.mrb[3].mxu0  ;;  %v196_v53 = vpop.f32.mrb[3].mxu1 }
 0x12e   :  { %767 = vpow2.f32 %v314_v49 }
 0x12f   :  { %769 = vpow2.f32 %v316_v48 }
 0x130   :  { %v699_v56 = vpop.f32.mrb[4].mxu0  ;;  %v711_v57 = vpop.f32.mrb[4].mxu1 }
 0x131   :  { %v166_v58 = vpop.f32.mrb[5].mxu0  ;;  %v206_v59 = vpop.f32.mrb[5].mxu1 }
 0x134   :  { %v702_v61 = vpop.f32.mrb[6].mxu0  ;;  %v714_v62 = vpop.f32.mrb[6].mxu1 }
 0x135   :  { %v176_v63 = vpop.f32.mrb[7].mxu0  ;;  %v216_v0 = vpop.f32.mrb[7].mxu1 }
 0x138   :  { %v768_v1 = vpop.eup %767 }
 0x139   :  { %v346_v2 = vsel %vm282_vm3, 0.0, %v768_v1  ;;  %v770_v3 = vpop.eup %769 }
 0x13a   :  { %429 = vadd.xlane.f32.xlu0 %v346_v2  ;;  %v347_v4 = vsel %vm283_vm5, 0.0, %v770_v3 }
 0x13e   :  { %431 = vadd.xlane.f32.xlu0 %v347_v4 }
 0x1c7   :  { %v430_v5 = vpop.xlane.xlu0 %429 }
 0x1c8   :  { %771 = vlog2.f32 %v430_v5 }
 0x1cb   :  { %v432_v6 = vpop.xlane.xlu0 %431 }
 0x1cc   :  { %773 = vlog2.f32 %v432_v6 }
 0x1d2   :  { %v772_v9 = vpop.eup %771 }
 0x1d3   :  { %v526_v11 = vmul.f32 0.6931472, %v772_v9 }
 0x1d5   :  { %v557_v12 = vadd.f32 %v526_v11, %v509_v8 }
 0x1d6   :  { %v774_v14 = vpop.eup %773 }
 0x1d7   :  { %590 = vst.msk [vmem:[%s956_s3] sm:$0xff] %vm589_vm0, %v557_v12  ;;  %v528_v15 = vmul.f32 0.6931472, %v774_v14 }
 0x1d9   :  { %v558_v16 = vadd.f32 %v528_v15, %v510_v13 }
 0x1db   :  { %591 = vst.msk [vmem:[%s956_s3 + $0x8] sm:$0xff] %vm589_vm0, %v558_v16 }
 0x1dc   :  { %610 = vsyncpa [#allocation4], 1 }

</bundles_post_ra>
